<compile_context>
chip_gen: v7x
topology: tpu7x:2x2x1
jax: 0.10.0
libtpu: 0.0.40
codegen_flags: <defaults>
</compile_context>

<pallas_src>
import numpy as np
import jax
import jax.numpy as jnp
from jax.experimental import pallas as pl
from jax.experimental.pallas import tpu as pltpu


def _calayer_kernel(x_ref, w1_ref, w2_ref, o_ref, gate_ref):
    # x_ref   : (TB, C, HW)  channels on sublanes, flattened spatial on lanes
    # w1_ref  : (Cr, C)      conv_du[0] 1x1 weight (PyTorch OI layout, bias=False)
    # w2_ref  : (C, Cr)      conv_du[2] 1x1 weight (PyTorch OI layout, bias=False)
    # o_ref   : (TB, C, HW)
    # gate_ref: (TB, C, 1)   f32 VMEM scratch holding the per-(batch, channel) gate
    tb = x_ref.shape[0]

    # Global average pool over the spatial (lane) axis. keepdims keeps the channel
    # axis on sublanes, so the gate never needs a lanes->sublanes relayout below.
    # (Accumulate in f32 so a bf16-streamed x stays accurate.)
    pooled = jnp.mean(x_ref[...].astype(jnp.float32), axis=-1, keepdims=True)  # (TB, C, 1)

    # Tiny channel MLP -- (Cr,C)@(C,1) -> ReLU -> (C,Cr)@(Cr,1) -> sigmoid.
    # TB is a small static constant, so this Python loop fully unrolls.
    for b in range(tb):
        h = jnp.dot(w1_ref[...], pooled[b], preferred_element_type=jnp.float32)  # (Cr, 1)
        h = jnp.maximum(h, 0.0)
        g = jnp.dot(w2_ref[...], h, preferred_element_type=jnp.float32)          # (C, 1)
        gate_ref[b] = jax.nn.sigmoid(g)

    # Re-read x from VMEM (vld slots are far from saturated) rather than keeping
    # the whole tile live in vregs across the MLP; the (TB, C, 1) gate broadcasts
    # along the lane (spatial) axis in the scale.
    o_ref[...] = (x_ref[...] * gate_ref[...]).astype(o_ref.dtype)


def _choose_batch_tile(B: int, per_batch_bytes: int, target_block_bytes: int) -> int:
    """Largest TB that (a) keeps one block within the VMEM budget, (b) leaves >= 2
    grid steps whenever B >= 2 (enables double-buffering and v7x megacore), and
    (c) divides B evenly (no ragged / masked tail blocks)."""
    tb = max(1, min(B, target_block_bytes // max(per_batch_bytes, 1), max(1, B // 2)))
    while B % tb:
        tb -= 1
    return tb


def calayer_forward(x_nchw: jax.Array, conv1_w_oihw: jax.Array,
                    conv2_w_oihw: jax.Array, *,
                    target_block_bytes: int = 4 << 20) -> jax.Array:
    """Pallas implementation of CALayer.forward.

    x_nchw:        (B, C, H, W)
    conv1_w_oihw:  (C//r, C, 1, 1)   bias=False
    conv2_w_oihw:  (C, C//r, 1, 1)   bias=False
    returns:       (B, C, H, W)
    """
    B, C, H, W = x_nchw.shape
    Cr = conv1_w_oihw.shape[0]
    HW = H * W
    # TODO(synk): if H*W is not a multiple of 128 at production sizes, fold/pad the
    # spatial axis so the big store stays lane-dense (unmasked vst).

    # NCHW flattens directly to the lane-dense (B, C, HW) layout -- no transposes.
    x_flat = x_nchw.reshape(B, C, HW)
    w1 = conv1_w_oihw[:, :, 0, 0]    # (Cr, C)  -- used as-is
    w2 = conv2_w_oihw[:, :, 0, 0]    # (C, Cr)  -- used as-is

    per_batch_bytes = C * HW * x_nchw.dtype.itemsize
    tb = _choose_batch_tile(B, per_batch_bytes, target_block_bytes)
    grid = (B // tb,)

    out_flat = pl.pallas_call(
        _calayer_kernel,
        out_shape=jax.ShapeDtypeStruct((B, C, HW), x_nchw.dtype),
        grid_spec=pltpu.PrefetchScalarGridSpec(
            num_scalar_prefetch=0,
            grid=grid,
            in_specs=[
                pl.BlockSpec((tb, C, HW), lambda i: (i, 0, 0)),   # x, B-tiled
                pl.BlockSpec((Cr, C), lambda i: (0, 0)),           # conv1 weight (resident)
                pl.BlockSpec((C, Cr), lambda i: (0, 0)),           # conv2 weight (resident)
            ],
            out_specs=pl.BlockSpec((tb, C, HW), lambda i: (i, 0, 0)),
            scratch_shapes=[pltpu.VMEM((tb, C, 1), jnp.float32)],  # channel gate
        ),
        compiler_params=pltpu.CompilerParams(
            dimension_semantics=("parallel",),   # batch tiles are independent -> megacore on v7x
            vmem_limit_bytes=32 << 20,           # safe on v5e/v6e/v7x; blocks budgeted to <= ~4 MiB
        ),
    )(x_flat, w1, w2)

    return out_flat.reshape(B, C, H, W)


def _reference(x, w1, w2):
    """Plain-JAX reference with identical PyTorch CALayer semantics."""
    y = jnp.mean(x, axis=(2, 3), keepdims=True)                  # AdaptiveAvgPool2d(1)
    y = jnp.einsum("oc,bcij->boij", w1[:, :, 0, 0], y)           # Conv2d(C, C//r, 1, bias=False)
    y = jnp.maximum(y, 0.0)                                      # ReLU
    y = jnp.einsum("oc,bcij->boij", w2[:, :, 0, 0], y)           # Conv2d(C//r, C, 1, bias=False)
    y = jax.nn.sigmoid(y)                                        # Sigmoid
    return x * y


if __name__ == "__main__":
    # Module config: CALayer(channel=64, reduction=16, bias=False)
    channel, reduction = 64, 16
    Cr = channel // reduction
    B, H, W = 2, 16, 16

    key = jax.random.PRNGKey(0)
    kx, k1, k2 = jax.random.split(key, 3)
    x = jax.random.normal(kx, (B, channel, H, W), dtype=jnp.float32)
    # Deterministic synthetic 1x1-conv weights (kaiming-uniform-like scale, no bias).
    b1 = 1.0 / np.sqrt(channel)
    w1 = jax.random.uniform(k1, (Cr, channel, 1, 1), dtype=jnp.float32,
                            minval=-b1, maxval=b1)
    b2 = 1.0 / np.sqrt(Cr)
    w2 = jax.random.uniform(k2, (channel, Cr, 1, 1), dtype=jnp.float32,
                            minval=-b2, maxval=b2)

    out = jax.block_until_ready(calayer_forward(x, w1, w2))
    ref = jax.block_until_ready(_reference(x, w1, w2))

    assert out.shape == (B, channel, H, W), out.shape
    assert np.allclose(np.asarray(out), np.asarray(ref), rtol=1e-4, atol=1e-5), (
        "mismatch vs reference")

    print("KERNEL_OK")
</pallas_src>

<mosaic_0001>
module attributes {stable_mosaic.version = 11 : i64} {
  func.func @_calayer_kernel(%arg0: i32, %arg1: memref<1x64x256xf32, #tpu.memory_space<vmem>>, %arg2: memref<4x64xf32, #tpu.memory_space<vmem>>, %arg3: memref<64x4xf32, #tpu.memory_space<vmem>>, %arg4: memref<1x64x256xf32, #tpu.memory_space<vmem>>, %arg5: memref<1x64x1xf32, #tpu.memory_space<vmem>>) attributes {dimension_semantics = [#tpu.dimension_semantics<parallel>], iteration_bounds = array<i64: 2>, scalar_prefetch = 0 : i64, scratch_operands = 1 : i64, tpu.core_type = #tpu.core_type<tc>, window_params = [{transform_indices = @transform_0, window_bounds = array<i64: 1, 64, 256>}, {pipeline_mode = #tpu.pipeline_mode<synchronous>, transform_indices = @transform_1, window_bounds = array<i64: 4, 64>}, {pipeline_mode = #tpu.pipeline_mode<synchronous>, transform_indices = @transform_2, window_bounds = array<i64: 64, 4>}, {transform_indices = @transform_3, window_bounds = array<i64: 1, 64, 256>}]} {
    %c0 = arith.constant 0 : index
    %c0_0 = arith.constant 0 : index
    %c0_1 = arith.constant 0 : index
    %0 = vector.load %arg1[%c0, %c0_0, %c0_1] : memref<1x64x256xf32, #tpu.memory_space<vmem>>, vector<1x64x256xf32>
    %cst = arith.constant dense<0.000000e+00> : vector<1x64xf32>
    %1 = vector.multi_reduction <add>, %0, %cst [2] : vector<1x64x256xf32> to vector<1x64xf32>
    %2 = vector.shape_cast %1 : vector<1x64xf32> to vector<1x64x1xf32>
    %cst_2 = arith.constant 2.560000e+02 : f32
    %3 = vector.broadcast %cst_2 : f32 to vector<1x64x1xf32>
    %4 = arith.divf %2, %3 : vector<1x64x1xf32>
    %c0_3 = arith.constant 0 : index
    %c0_4 = arith.constant 0 : index
    %5 = vector.load %arg2[%c0_3, %c0_4] : memref<4x64xf32, #tpu.memory_space<vmem>>, vector<4x64xf32>
    %6 = vector.shape_cast %4 : vector<1x64x1xf32> to vector<64x1xf32>
    %cst_5 = arith.constant dense<0.000000e+00> : vector<4x1xf32>
    %7 = tpu.matmul %5, %6, %cst_5 {dimension_numbers = #tpu.dot_dimension_numbers<[1], [0], [0], [1], [0, 0, 1, 1], [], []>} : vector<4x64xf32>, vector<64x1xf32>, vector<4x1xf32> -> vector<4x1xf32>
    %cst_6 = arith.constant 0.000000e+00 : f32
    %8 = vector.broadcast %cst_6 : f32 to vector<4x1xf32>
    %9 = arith.maximumf %7, %8 : vector<4x1xf32>
    %c0_7 = arith.constant 0 : index
    %c0_8 = arith.constant 0 : index
    %10 = vector.load %arg3[%c0_7, %c0_8] : memref<64x4xf32, #tpu.memory_space<vmem>>, vector<64x4xf32>
    %cst_9 = arith.constant dense<0.000000e+00> : vector<64x1xf32>
    %11 = tpu.matmul %10, %9, %cst_9 {dimension_numbers = #tpu.dot_dimension_numbers<[1], [0], [0], [1], [0, 0, 1, 1], [], []>} : vector<64x4xf32>, vector<4x1xf32>, vector<64x1xf32> -> vector<64x1xf32>
    %12 = arith.negf %11 : vector<64x1xf32>
    %13 = math.exp %12 : vector<64x1xf32>
    %cst_10 = arith.constant 1.000000e+00 : f32
    %14 = vector.broadcast %cst_10 : f32 to vector<64x1xf32>
    %15 = arith.addf %14, %13 : vector<64x1xf32>
    %16 = arith.divf %14, %15 : vector<64x1xf32>
    %c0_11 = arith.constant 0 : index
    %c0_12 = arith.constant 0 : index
    %c0_13 = arith.constant 0 : index
    %17 = vector.load %arg5[%c0_11, %c0_12, %c0_13] : memref<1x64x1xf32, #tpu.memory_space<vmem>>, vector<1x64x1xf32>
    %18 = vector.shape_cast %17 : vector<1x64x1xf32> to vector<64x1xf32>
    %19 = vector.shape_cast %16 : vector<64x1xf32> to vector<1x64x1xf32>
    tpu.vector_store %arg5[%c0_11, %c0_12, %c0_13], %19 {strides = array<i32>} : memref<1x64x1xf32, #tpu.memory_space<vmem>>, vector<1x64x1xf32>,
    %c0_14 = arith.constant 0 : index
    %c0_15 = arith.constant 0 : index
    %c0_16 = arith.constant 0 : index
    %20 = vector.load %arg1[%c0_14, %c0_15, %c0_16] : memref<1x64x256xf32, #tpu.memory_space<vmem>>, vector<1x64x256xf32>
    %c0_17 = arith.constant 0 : index
    %c0_18 = arith.constant 0 : index
    %c0_19 = arith.constant 0 : index
    %21 = vector.load %arg5[%c0_17, %c0_18, %c0_19] : memref<1x64x1xf32, #tpu.memory_space<vmem>>, vector<1x64x1xf32>
    %22 = vector.broadcast %21 : vector<1x64x1xf32> to vector<1x64x256xf32>
    %23 = arith.mulf %20, %22 : vector<1x64x256xf32>
    %c0_20 = arith.constant 0 : index
    %c0_21 = arith.constant 0 : index
    %c0_22 = arith.constant 0 : index
    %24 = vector.load %arg4[%c0_20, %c0_21, %c0_22] : memref<1x64x256xf32, #tpu.memory_space<vmem>>, vector<1x64x256xf32>
    tpu.vector_store %arg4[%c0_20, %c0_21, %c0_22], %23 {strides = array<i32>} : memref<1x64x256xf32, #tpu.memory_space<vmem>>, vector<1x64x256xf32>,
    return
  }
  func.func @transform_0(%arg0: i32) -> (i32, i32, i32) {
    %c0_i32 = arith.constant 0 : i32
    %c0_i32_0 = arith.constant 0 : i32
    %c0_i32_1 = arith.constant 0 : i32
    return %arg0, %c0_i32, %c0_i32_0 : i32, i32, i32
  }
  func.func @transform_1(%arg0: i32) -> (i32, i32) {
    %c0_i32 = arith.constant 0 : i32
    %c0_i32_0 = arith.constant 0 : i32
    %c0_i32_1 = arith.constant 0 : i32
    return %c0_i32, %c0_i32_0 : i32, i32
  }
  func.func @transform_2(%arg0: i32) -> (i32, i32) {
    %c0_i32 = arith.constant 0 : i32
    %c0_i32_0 = arith.constant 0 : i32
    %c0_i32_1 = arith.constant 0 : i32
    return %c0_i32, %c0_i32_0 : i32, i32
  }
  func.func @transform_3(%arg0: i32) -> (i32, i32, i32) {
    %c0_i32 = arith.constant 0 : i32
    %c0_i32_0 = arith.constant 0 : i32
    %c0_i32_1 = arith.constant 0 : i32
    return %arg0, %c0_i32, %c0_i32_0 : i32, i32, i32
  }
}

</mosaic_0001>

<bundles_post_ra>
// kernel: tpu_custom_call.1
= control target key start
LH: loop header
LB: loop body
LE: loop exit
PB: predicated region body
PF: predicated region fallthrough
CT: control target
= control target key end

     0   :  { %8 = vsyncpa [#allocation4], 0  ;;  %s1301_s0 = inlined_call_operand.hbm [shape: f32[2,64,256], index: 0, kind: input, shape index: {}]   ;;  %s1302_s1 = inlined_call_operand.vmem [shape: f32[4,64], index: 1, kind: input, shape index: {}]   ;;  %s1303_s2 = inlined_call_operand.vmem [shape: f32[64,4], index: 2, kind: input, shape index: {}]   ;;  %s1304_s3 = inlined_call_operand.hbm [shape: f32[2,64,256], index: 3, kind: output, shape index: {}]  }
   0x1   :  { %10 = vsyncpa [#allocation4 + $0x1], 0 }
   0x2   :  { %11 = vsyncpa [#allocation5], 0 }
   0x3   :  { %13 = vsyncpa [#allocation5 + $0x1], 0  ;;  %s1009_s12 = smov 0   ;;  %s1011_s13 = smov 0  }
   0x4   :  { %s1013_s14 = smov 0   ;;  %s1015_s15 = smov 0  }
   0x5 LB: > { %s1030_s16 = sadd.s32 4294967295, %s977_s15   ;;  %s696_s17 = sadd.s32 4294967294, %s977_s15   ;;  %s977_s15 = sphi %s1015_s15, %s1317_s15   ;;  %s973_s14 = sphi %s1013_s14, %s1316_s14   ;;  %s969_s13 = sphi %s1011_s13, %s1315_s13   ;;  %s965_s12 = sphi %s1009_s12, %s1314_s12  }
   0x6   : > { %s1034_s18 = sadd.s32 1, %s977_s15   ;;  %s26_s19 = sadd.s32 1, %s973_s14 }
   0x7   : > { %s23_s20 = ssub.s32 %s977_s15, %s1034_s18  ;;  %p33_p0 = scmp.ne.s32.totalorder %s973_s14, %s969_s13 }
   0x8   : > { %p24_p1 = scmp.eq.s32.totalorder %s23_s20, 0  ;;  %p34_p2 = scmp.eq.s32.totalorder %s977_s15, 0 }
   0x9   : > { %p39_p3 = scmp.ne.s32.totalorder %s969_s13, %s965_s12  ;;  %p40_p4 = scmp.eq.s32.totalorder %s1030_s16, 0 }
   0xa   : > { %s1046_s21 = scalar_select %p24_p1, %s973_s14, %s26_s19  }
   0xb   : > { %p1048_p5 = por %p34_p2, %p33_p0  ;;  %p1052_p6 = por %p40_p4, %p39_p3 }
   0xc   : > { %p105_p7 = scmp.eq.s32.totalorder %s1030_s16, 1  ;;  %p111_p8 = scmp.eq.s32.totalorder %s696_s17, 1 }
   0xd   : > { %p805_p10 = scmp.lt.s32.totalorder %s977_s15, 2  ;;  %s137_s26 = sand.u32 1, %s973_s14  }
   0xe   : > { %p1059_p11 = por %p105_p7, %p33_p0  ;;  %p1063_p12 = por %p111_p8, %p39_p3 }
   0xf   : > { %s728_s27 = sshll.u32 %s977_s15, 11  ;;  %s699_s28 = sshll.u32 %s137_s26, 7 }
  0x10   : > { %s1308_s24 = scalar_select %p1059_p11, 1, 0 }
  0x11   : > { %s1309_s25 = scalar_select %p1063_p12, 1, 0 }
  0x12   : > { %s1072_s4 = scalar_lea.hbm %s1301_s0, %s728_s27  ;;  %s141_s5 = scalar_lea.vmem [#allocation3], %s699_s28 }
  0x13   : > { %s148_s6 = sshll.u32 %s141_s5, 4  ;;  %p1076_p13 = pnand %p805_p10, %p1048_p5  ;;  %s1080_s6 = int_to_ptr.vmem [resolvable:$true] %s148_s6 }
  0x14   : > { %s1082_s8 = scalar_lea.sflag [#allocation4], %s137_s26  ;;  %s881_s9 = scalar_lea.hbm %s1072_s4, 2048 }
  0x15   : > { %p882_p0 = scmp.ne.s32.totalorder %s1072_s4, %s881_s9  ;;  %p883_p1 = pneg %p1076_p13 }
  0x16   : > { %s886_s17 = scalar_lea.hbm %s1301_s0, 4096  ;;  %p887_p4 = scmp.lt.u32.totalorder %s1072_s4, %s1301_s0 }
  0x17   : > { %p884_p2 = pnand %p883_p1, %p882_p0  ;;  %p888_p5 = scmp.lt.u32.totalorder %s886_s17, %s881_s9 }
  0x18   : > { %p890_p8 = scmp.lt.u32.totalorder %s881_s9, %s1072_s4 }
  0x19   : > { %p885_p3 = pneg %p884_p2  ;;  %p889_p7 = por %p888_p5, %p887_p4 }
  0x1b   : > { %p891_p10 = por %p890_p8, %p889_p7 }
  0x1d   : > { %p892_p9 = pnand %p891_p10, %p885_p3 }
  0x1f   : > { %895 = shalt.err (!%p892_p9)
}
  0x20   : > { %s896_s22 = scalar_lea.vmem %s1080_s6, 2048  ;;  %s979_s26 = smov [#allocation3]  }
  0x21   : > { %p897_p0 = scmp.ne.s32.totalorder %s1080_s6, %s896_s22  ;;  %s901_s27 = sshll.u32 %s979_s26, 4  ;;  %s902_s27 = int_to_ptr.vmem [resolvable:$false] %s901_s27 }
  0x22   : > { %s903_s28 = scalar_lea.vmem %s902_s27, 4096  ;;  %p904_p11 = scmp.lt.s32.totalorder %s1080_s6, %s902_s27 }
  0x23   : > { %p899_p2 = pnand %p897_p0, %p883_p1  ;;  %p905_p4 = scmp.lt.s32.totalorder %s903_s28, %s896_s22 }
  0x25   : > { %p900_p12 = pneg %p899_p2  ;;  %p906_p5 = por %p905_p4, %p904_p11 }
  0x27   : > { %p907_p7 = pnand %p906_p5, %p900_p12 }
  0x29   : > { %910 = shalt.err (!%p907_p7)
}
  0x2a   : > { %s980_s29 = smov 256   ;;  %s981_s30 = smov 16  }
  0x2b   : > { %800 = dma.hbm_to_vmem [thread:$0]  (!%p1076_p13), %s1072_s4, 2048, %s1080_s6, %s1082_s8, %s980_s29, %s980_s29, %s981_s30  }
  0x2c   : > { %p702_p9 = scmp.ge.s32.totalorder %s977_s15, 1  ;;  %p156_p1 = scmp.lt.s32.totalorder %s977_s15, 3 }
  0x2e   : > { %p157_p3 = pnand %p702_p9, %p156_p1 }
  0x2f   : > { %s1113_s5 = sand.u32 (!%p157_p3), 1, %s969_s13  }
  0x30   : > { %160 = sbr.rel (%p157_p3) target bundleno = 856 (0x358), region = 32  ;;  %s703_s9 = sshll.u32 (!%p157_p3), %s1113_s5, 7 }
  0x31   : > { %s163_s10 = scalar_lea.sflag (!%p157_p3), [#allocation4], %s1113_s5  ;;  %s166_s11 = scalar_lea.vmem (!%p157_p3), [#allocation3], %s703_s9 }
  0x37   : > { %956 = dma.done.wait (%p1052_p6), %s163_s10, 2048  }
  0x38   : > { %958 = vsyncadd (%p1052_p6), %s163_s10, 4294965248  ;;  %v1123_v0 = vld [vmem:[%s166_s11 + $0x20] sm:$0xff]  ;;  %v1125_v1 = vld [vmem:[%s166_s11 + $0x28] sm:$0xff]  ;;  %v982_v24 = vmov 0.0|0.0   ;;  %vm983_vm0 = vmmov 0   ;;  %v984_v25 = vmov 0.0  }
  0x39   : > { %v1127_v2 = vld [vmem:[%s166_s11] sm:$0xff]  ;;  %v211_v3 = vadd.f32 %v1125_v1, %v1123_v0  ;;  %v1131_v4 = vld [vmem:[%s166_s11 + $0x8] sm:$0xff]  ;;  %v1133_v5 = vld [vmem:[%s166_s11 + $0x30] sm:$0xff]  ;;  %781 = vmatprep.subr.bf16.mxu0 %v982_v24  ;;  %764 = vmatprep.mubr.msk.f32.mxu0 %vm983_vm0, %v984_v25  ;;  %vm239_vm1 = vcmask 523264   ;;  %vm322_vm2 = vcmask 31744   ;;  %vm347_vm3 = vcmask 1043456  }
  0x3a   : > { %v1135_v6 = vld [vmem:[%s166_s11 + $0x38] sm:$0xff]  ;;  %v205_v7 = vadd.f32 %v1131_v4, %v1127_v2  ;;  %v1139_v8 = vld [vmem:[%s166_s11 + $0x10] sm:$0xff]  ;;  %v1151_v14 = vld [vmem:[%s166_s11 + $0x40] sm:$0xff]  ;;  %v985_v58 = vmov 0   ;;  %vm504_vm4 = vcmask 7168   ;;  %s1220_s6 = scalar_lea.vmem [#allocation6], %s703_s9 }
  0x3b   : > { %v1141_v9 = vld [vmem:[%s166_s11 + $0x18] sm:$0xff]  ;;  %212 = vadd.xlane.f32.xlu1 %v211_v3  ;;  %v214_v10 = vadd.f32 %v1135_v6, %v1133_v5  ;;  %v1147_v12 = vld [vmem:[%s166_s11 + $0x50] sm:$0xff]  ;;  %v1153_v15 = vld [vmem:[%s166_s11 + $0x48] sm:$0xff]  ;;  %847 = vset.pattern.permute.xlu0 %v985_v58  ;;  %s729_s9 = sshll.u32 %s1030_s16, 11  ;;  %s623_s7 = sshll.u32 %s1220_s6, 4  ;;  %s1253_s7 = int_to_ptr.vmem [resolvable:$true] %s623_s7 }
  0x3c   : > { %206 = vadd.xlane.f32.xlu0 %v205_v7  ;;  %v208_v11 = vadd.f32 %v1141_v9, %v1139_v8  ;;  %v1149_v13 = vld [vmem:[%s166_s11 + $0x58] sm:$0xff]  ;;  %v217_v17 = vadd.f32 %v1153_v15, %v1151_v14  ;;  %v1159_v18 = vld [vmem:[%s166_s11 + $0x70] sm:$0xff]  ;;  %v1163_v20 = vld [vmem:[%s166_s11 + $0x60] sm:$0xff]  ;;  %848 = vset.pattern.permute.xlu1 %v985_v58  ;;  %s1251_s19 = scalar_lea.hbm %s1304_s3, %s729_s9  ;;  %s610_s16 = scalar_lea.sflag [#allocation5], %s1113_s5 }
  0x3d   : > { %v220_v16 = vadd.f32 %v1149_v13, %v1147_v12  ;;  %v1161_v19 = vld [vmem:[%s166_s11 + $0x78] sm:$0xff]  ;;  %v1165_v21 = vld [vmem:[%s166_s11 + $0x68] sm:$0xff]  ;;  %v238_v46 = vld [vmem:[%s1302_s1] sm:$0xf]  ;;  %s911_s20 = scalar_lea.vmem %s1253_s7, 2048  ;;  %p1311_p11 = scmp.ne.s32.totalorder %s1308_s24, 0 }
  0x3e   : > { %v226_v22 = vadd.f32 %v1161_v19, %v1159_v18  ;;  %v223_v23 = vadd.f32 %v1165_v21, %v1163_v20  ;;  %v314_v47 = vld [vmem:[%s1303_s2] sm:$0xff]  ;;  %v315_v51 = vld [vmem:[%s1303_s2 + $0x8] sm:$0xff]  ;;  %v316_v52 = vld [vmem:[%s1303_s2 + $0x10] sm:$0xff]  ;;  %p912_p6 = scmp.ne.s32.totalorder %s1253_s7, %s911_s20  ;;  %s986_s22 = smov [#allocation6]  }
  0x3f   : > { %215 = vadd.xlane.f32.xlu1 %v214_v10  ;;  %769 = vmatprep.mubr.msk.f32.mxu1 %vm322_vm2, %v314_v47  ;;  %v317_v53 = vld [vmem:[%s1303_s2 + $0x18] sm:$0xff]  ;;  %v318_v54 = vld [vmem:[%s1303_s2 + $0x20] sm:$0xff]  ;;  %v319_v55 = vld [vmem:[%s1303_s2 + $0x28] sm:$0xff]  ;;  %s915_s26 = sshll.u32 %s986_s22, 4  ;;  %s916_s26 = int_to_ptr.vmem [resolvable:$false] %s915_s26 }
  0x40   : > { %209 = vadd.xlane.f32.xlu0 %v208_v11  ;;  %v320_v56 = vld [vmem:[%s1303_s2 + $0x30] sm:$0xff]  ;;  %v321_v57 = vld [vmem:[%s1303_s2 + $0x38] sm:$0xff]  ;;  %p913_p12 = pnand %p912_p6, %p1311_p11  ;;  %s917_s27 = scalar_lea.vmem %s916_s26, 4096 }
  0x41   : > { %p918_p8 = scmp.lt.s32.totalorder %s1253_s7, %s916_s26  ;;  %p919_p10 = scmp.lt.s32.totalorder %s917_s27, %s911_s20 }
  0x42   : > { %p914_p13 = pneg %p913_p12 }
  0x43   : > { %221 = vadd.xlane.f32.xlu1 %v220_v16  ;;  %p920_p0 = por %p919_p10, %p918_p8 }
  0x44   : > { %218 = vadd.xlane.f32.xlu0 %v217_v17 }
  0x45   : > { %p921_p2 = pnand %p920_p0, %p914_p13 }
  0x47   : > { %227 = vadd.xlane.f32.xlu1 %v226_v22 }
  0x48   : > { %224 = vadd.xlane.f32.xlu0 %v223_v23 }
  0xc8   : > { %v213_v26 = vpop.xlane.xlu1 %212 }
  0xc9   : > { %v207_v27 = vpop.xlane.xlu0 %206  ;;  %v232_v32 = vmul.f32 0.00390625, %v213_v26 }
  0xca   : > { %v230_v30 = vmul.f32 0.00390625, %v207_v27 }
  0xcc   : > { %v216_v28 = vpop.xlane.xlu1 %215 }
  0xcd   : > { %v210_v29 = vpop.xlane.xlu0 %209  ;;  %v233_v33 = vmul.f32 0.00390625, %v216_v28 }
  0xce   : > { %v231_v31 = vmul.f32 0.00390625, %v210_v29 }
  0xcf   : > { %v785_v39 = vpack.c.bf16 %v233_v33, %v232_v32 }
  0xd0   : > { %v782_v34 = vpack.c.bf16 %v231_v31, %v230_v30  ;;  %v222_v35 = vpop.xlane.xlu1 %221 }
  0xd1   : > { %v219_v36 = vpop.xlane.xlu0 %218  ;;  %v235_v37 = vmul.f32 0.00390625, %v222_v35 }
  0xd2   : > { %783 = vmatpush3.bf16.msra.mxu0 %v782_v34  ;;  %v234_v38 = vmul.f32 0.00390625, %v219_v36 }
  0xd3   : > { %784 = vmatprep.subr.bf16.mxu0 %v982_v24 }
  0xd4   : > { %v228_v40 = vpop.xlane.xlu1 %227  ;;  %v788_v42 = vpack.c.bf16 %v235_v37, %v234_v38 }
  0xd5   : > { %v225_v41 = vpop.xlane.xlu0 %224  ;;  %v237_v43 = vmul.f32 0.00390625, %v228_v40 }
  0xd6   : > { %786 = vmatpush3.bf16.msra.mxu0 %v785_v39  ;;  %v236_v44 = vmul.f32 0.00390625, %v225_v41 }
  0xd7   : > { %787 = vmatprep.subr.bf16.mxu0 %v982_v24 }
  0xd8   : > { %v791_v45 = vpack.c.bf16 %v237_v43, %v236_v44 }
  0xda   : > { %789 = vmatpush3.bf16.msra.mxu0 %v788_v42 }
  0xdb   : > { %790 = vmatprep.subr.bf16.mxu0 %v982_v24 }
  0xde   : > { %792 = vmatpush3.bf16.msra.mxu0 %v791_v45 }
  0xe1   : > { %765 = vmatmul.mubr.msk.f32.vlgmr.msra.gmra.mrb[0].mxu0 %vm239_vm1, %v238_v46 }
 0x1b4   : > { %v309_v48 = vpop.f32.mrb[0].mxu0 }
 0x1b5   : > { %v313_v49 = vmax.f32 %v309_v48, 0.0  ;;  %v766_v50 = vpop.f32.mrb[1].mxu0 }
 0x1b7   : > { %767 = vmatprep.subr.msk.mxu1 %vm347_vm3, %v313_v49 }
 0x1b8   : > { %768 = vmatpush3.msk.msra.mxu1 %vm347_vm3, %v313_v49 }
 0x1b9   : > { %770 = vmatmul.mubr.msk.f32.vlgmr.msra.gmra.mrb[0].mxu1 %vm322_vm2, %v315_v51 }
 0x1ba   : > { %772 = vmatprep.mubr.msk.f32.mxu1 %vm322_vm2, %v316_v52 }
 0x1bd   : > { %773 = vmatmul.mubr.msk.f32.gmra.mrb[2].mxu1 %vm322_vm2, %v317_v53 }
 0x1be   : > { %775 = vmatprep.mubr.msk.f32.mxu1 %vm322_vm2, %v318_v54 }
 0x1c1   : > { %776 = vmatmul.mubr.msk.f32.gmra.mrb[4].mxu1 %vm322_vm2, %v319_v55 }
 0x1c2   : > { %778 = vmatprep.mubr.msk.f32.mxu1 %vm322_vm2, %v320_v56 }
 0x1c5   : > { %779 = vmatmul.mubr.msk.f32.gmra.mrb[6].mxu1 %vm322_vm2, %v321_v57 }
 0x28c   : > { %v771_v59 = vpop.f32.mrb[0].mxu1 }
 0x28d   : > { %v716_v60 = vmul.f32 -1.442695, %v771_v59  ;;  %v417_v61 = vpop.f32.mrb[1].mxu1 }
 0x28e   : > { %v715_v62 = vmul.f32 -1.442695, %v417_v61 }
 0x28f   : > { %849 = vpow2.f32 %v716_v60 }
 0x290   : > { %851 = vpow2.f32 %v715_v62  ;;  %v774_v63 = vpop.f32.mrb[2].mxu1 }
 0x291   : > { %v718_v3 = vmul.f32 -1.442695, %v774_v63  ;;  %v427_v7 = vpop.f32.mrb[3].mxu1 }
 0x292   : > { %v717_v10 = vmul.f32 -1.442695, %v427_v7 }
 0x293   : > { %853 = vpow2.f32 %v718_v3 }
 0x294   : > { %855 = vpow2.f32 %v717_v10  ;;  %v777_v11 = vpop.f32.mrb[4].mxu1 }
 0x295   : > { %v720_v16 = vmul.f32 -1.442695, %v777_v11  ;;  %v437_v17 = vpop.f32.mrb[5].mxu1 }
 0x296   : > { %v719_v22 = vmul.f32 -1.442695, %v437_v17 }
 0x297   : > { %857 = vpow2.f32 %v720_v16 }
 0x298   : > { %859 = vpow2.f32 %v719_v22  ;;  %v780_v23 = vpop.f32.mrb[6].mxu1 }
 0x299   : > { %v850_v24 = vpop.eup %849  ;;  %v722_v25 = vmul.f32 -1.442695, %v780_v23  ;;  %v447_v26 = vpop.f32.mrb[7].mxu1 }
 0x29a   : > { %v852_v27 = vpop.eup %851  ;;  %v481_v28 = vadd.f32 1.0, %v850_v24  ;;  %v721_v29 = vmul.f32 -1.442695, %v447_v26 }
 0x29b   : > { %v480_v30 = vadd.f32 1.0, %v852_v27  ;;  %861 = vpow2.f32 %v722_v25 }
 0x29c   : > { %863 = vrcp.f32 %v481_v28 }
 0x29d   : > { %v854_v31 = vpop.eup %853  ;;  %865 = vrcp.f32 %v480_v30 }
 0x29e   : > { %v856_v32 = vpop.eup %855  ;;  %v483_v33 = vadd.f32 1.0, %v854_v31  ;;  %867 = vpow2.f32 %v721_v29 }
 0x29f   : > { %v482_v34 = vadd.f32 1.0, %v856_v32 }
 0x2a0   : > { %869 = vrcp.f32 %v483_v33 }
 0x2a1   : > { %v858_v35 = vpop.eup %857  ;;  %871 = vrcp.f32 %v482_v34 }
 0x2a2   : > { %v860_v36 = vpop.eup %859  ;;  %v485_v37 = vadd.f32 1.0, %v858_v35 }
 0x2a3   : > { %v484_v38 = vadd.f32 1.0, %v860_v36 }
 0x2a4   : > { %873 = vrcp.f32 %v485_v37 }
 0x2a5   : > { %v862_v39 = vpop.eup %861  ;;  %875 = vrcp.f32 %v484_v38 }
 0x2a6   : > { %v864_v40 = vpop.eup %863  ;;  %v487_v41 = vadd.f32 1.0, %v862_v39 }
 0x2a7   : > { %v866_v42 = vpop.eup %865  ;;  %506 = vst.msk [vmem:[#allocation2 + $0x8] sm:$0xff] %vm504_vm4, %v864_v40 }
 0x2a8   : > { %v868_v43 = vpop.eup %867  ;;  %505 = vst.msk [vmem:[#allocation2] sm:$0xff] %vm504_vm4, %v866_v42  ;;  %877 = vrcp.f32 %v487_v41 }
 0x2a9   : > { %v486_v44 = vadd.f32 1.0, %v868_v43 }
 0x2aa   : > { %v870_v45 = vpop.eup %869 }
 0x2ab   : > { %v872_v46 = vpop.eup %871  ;;  %508 = vst.msk [vmem:[#allocation2 + $0x18] sm:$0xff] %vm504_vm4, %v870_v45  ;;  %879 = vrcp.f32 %v486_v44 }
 0x2ac   : > { %507 = vst.msk [vmem:[#allocation2 + $0x10] sm:$0xff] %vm504_vm4, %v872_v46 }
 0x2ae   : > { %v874_v47 = vpop.eup %873  ;;  %v530_v48 = vld [vmem:[#allocation2 + $0x8] sm:$0xff] }
 0x2af   : > { %v876_v49 = vpop.eup %875  ;;  %510 = vst.msk [vmem:[#allocation2 + $0x28] sm:$0xff] %vm504_vm4, %v874_v47  ;;  %544 = vperm.xlu1 %848, %v530_v48   ;;  %v529_v50 = vld [vmem:[#allocation2] sm:$0xff] }
 0x2b0   : > { %509 = vst.msk [vmem:[#allocation2 + $0x20] sm:$0xff] %vm504_vm4, %v876_v49  ;;  %539 = vperm.xlu0 %847, %v529_v50  }
 0x2b2   : > { %v878_v51 = vpop.eup %877  ;;  %v532_v52 = vld [vmem:[#allocation2 + $0x18] sm:$0xff] }
 0x2b3   : > { %512 = vst.msk [vmem:[#allocation2 + $0x38] sm:$0xff] %vm504_vm4, %v878_v51  ;;  %554 = vperm.xlu1 %848, %v532_v52   ;;  %v531_v54 = vld [vmem:[#allocation2 + $0x10] sm:$0xff] }
 0x2b5   : > { %v880_v53 = vpop.eup %879 }
 0x2b6   : > { %511 = vst.msk [vmem:[#allocation2 + $0x30] sm:$0xff] %vm504_vm4, %v880_v53  ;;  %v534_v55 = vld [vmem:[#allocation2 + $0x28] sm:$0xff] }
 0x2b7   : > { %549 = vperm.xlu1 %848, %v531_v54   ;;  %v533_v56 = vld [vmem:[#allocation2 + $0x20] sm:$0xff] }
 0x2ba   : > { %v536_v58 = vld [vmem:[#allocation2 + $0x38] sm:$0xff] }
 0x2bb   : > { %564 = vperm.xlu1 %848, %v534_v55  }
 0x2bd   : > { %v535_v57 = vld [vmem:[#allocation2 + $0x30] sm:$0xff] }
 0x2bf   : > { %559 = vperm.xlu1 %848, %v533_v56  }
 0x2c3   : > { %569 = vperm.xlu1 %848, %v535_v57  }
 0x2c7   : > { %574 = vperm.xlu1 %848, %v536_v58  }
 0x32e   : > { %v545_v59 = vpop.permute.xlu1 %544 }
 0x32f   : > { %v579_v60 = vmul.f32 %v545_v59, %v1139_v8  ;;  %v580_v61 = vmul.f32 %v545_v59, %v1141_v9  ;;  %v540_v62 = vpop.permute.xlu0 %539 }
 0x330   : > { %v577_v63 = vmul.f32 %v540_v62, %v1127_v2  ;;  %v578_v3 = vmul.f32 %v540_v62, %v1131_v4 }
 0x331   : > { %595 = vst [vmem:[%s1220_s6 + $0x10] sm:$0xff] %v579_v60  ;;  %596 = vst [vmem:[%s1220_s6 + $0x18] sm:$0xff] %v580_v61 }
 0x332   : > { %593 = vst [vmem:[%s1220_s6] sm:$0xff] %v577_v63  ;;  %594 = vst [vmem:[%s1220_s6 + $0x8] sm:$0xff] %v578_v3  ;;  %v555_v2 = vpop.permute.xlu1 %554 }
 0x333   : > { %v583_v4 = vmul.f32 %v555_v2, %v1133_v5  ;;  %v584_v8 = vmul.f32 %v555_v2, %v1135_v6 }
 0x335   : > { %599 = vst [vmem:[%s1220_s6 + $0x30] sm:$0xff] %v583_v4  ;;  %600 = vst [vmem:[%s1220_s6 + $0x38] sm:$0xff] %v584_v8 }
 0x336   : > { %v550_v9 = vpop.permute.xlu1 %549 }
 0x337   : > { %v581_v7 = vmul.f32 %v550_v9, %v1123_v0  ;;  %v582_v10 = vmul.f32 %v550_v9, %v1125_v1 }
 0x339   : > { %597 = vst [vmem:[%s1220_s6 + $0x20] sm:$0xff] %v581_v7  ;;  %598 = vst [vmem:[%s1220_s6 + $0x28] sm:$0xff] %v582_v10 }
 0x33a   : > { %v565_v11 = vpop.permute.xlu1 %564 }
 0x33b   : > { %v587_v5 = vmul.f32 %v565_v11, %v1147_v12  ;;  %v588_v6 = vmul.f32 %v565_v11, %v1149_v13 }
 0x33d   : > { %603 = vst [vmem:[%s1220_s6 + $0x50] sm:$0xff] %v587_v5  ;;  %604 = vst [vmem:[%s1220_s6 + $0x58] sm:$0xff] %v588_v6 }
 0x33e   : > { %v560_v16 = vpop.permute.xlu1 %559 }
 0x33f   : > { %v585_v17 = vmul.f32 %v560_v16, %v1151_v14  ;;  %v586_v0 = vmul.f32 %v560_v16, %v1153_v15 }
 0x341   : > { %601 = vst [vmem:[%s1220_s6 + $0x40] sm:$0xff] %v585_v17  ;;  %602 = vst [vmem:[%s1220_s6 + $0x48] sm:$0xff] %v586_v0 }
 0x342   : > { %v570_v1 = vpop.permute.xlu1 %569 }
 0x343   : > { %v589_v22 = vmul.f32 %v570_v1, %v1163_v20  ;;  %v590_v12 = vmul.f32 %v570_v1, %v1165_v21 }
 0x345   : > { %605 = vst [vmem:[%s1220_s6 + $0x60] sm:$0xff] %v589_v22  ;;  %606 = vst [vmem:[%s1220_s6 + $0x68] sm:$0xff] %v590_v12 }
 0x346   : > { %v575_v13 = vpop.permute.xlu1 %574 }
 0x347   : > { %v591_v14 = vmul.f32 %v575_v13, %v1159_v18  ;;  %v592_v15 = vmul.f32 %v575_v13, %v1161_v19 }
 0x349   : > { %607 = vst [vmem:[%s1220_s6 + $0x70] sm:$0xff] %v591_v14  ;;  %608 = vst [vmem:[%s1220_s6 + $0x78] sm:$0xff] %v592_v15 }
 0x34a   : > { %924 = shalt.err (!%p921_p2)
}
 0x34b   : > { %s925_s28 = scalar_lea.hbm %s1251_s19, 2048  ;;  %s929_s10 = scalar_lea.hbm %s1304_s3, 4096 }
 0x34c   : > { %p926_p4 = scmp.ne.s32.totalorder %s1251_s19, %s925_s28  ;;  %p930_p9 = scmp.lt.u32.totalorder %s1251_s19, %s1304_s3 }
 0x34d   : > { %p931_p1 = scmp.lt.u32.totalorder %s929_s10, %s925_s28  ;;  %p933_p6 = scmp.lt.u32.totalorder %s925_s28, %s1251_s19 }
 0x34e   : > { %p927_p5 = pnand %p926_p4, %p1311_p11 }
 0x34f   : > { %p932_p3 = por %p931_p1, %p930_p9 }
 0x350   : > { %p928_p7 = pneg %p927_p5 }
 0x351   : > { %p934_p12 = por %p933_p6, %p932_p3 }
 0x353   : > { %p935_p13 = pnand %p934_p12, %p928_p7 }
 0x355   : > { %938 = shalt.err (!%p935_p13)
}
 0x356   : > { %s987_s4 = smov 256   ;;  %s988_s6 = smov 16  }
 0x357   : > { %795 = dma.vmem_to_hbm [thread:$0]  (%p1311_p11), %s1253_s7, 2048, %s1251_s19, %s610_s16, %s987_s4, %s987_s4, %s988_s6  }
 0x358 PF: > { %s638_s9 = sand.u32 1, %s965_s12   ;;  %p1312_p8 = scmp.ne.s32.totalorder %s1309_s25, 0 }
 0x359   : > { %p1313_p10 = scmp.ge.s32.totalorder %s977_s15, 2  ;;  %s639_s8 = scalar_lea.sflag [#allocation5], %s638_s9 }
 0x35b   : > { %p802_p0 = pnand %p1313_p10, %p1312_p8 }
 0x35d   : > { %960 = dma.done.wait (!%p802_p0), %s639_s8, 2048  }
 0x35e   : > { %962 = vsyncadd (!%p802_p0), %s639_s8, 4294965248  ;;  %p16_p2 = scmp.ge.s32.totalorder %s1034_s18, 4   ;;  %s1314_s12 = smov %s969_s13 }
 0x35f   : > { %s1315_s13 = smov %s973_s14  ;;  %s1316_s14 = smov %s1046_s21 }
 0x360   : > { %s1317_s15 = smov %s1034_s18  ;;  %18 = sbr.rel (!%p16_p2) target bundleno = 5 (0x5), region = 77 }
 0x367   :  { %644 = vsyncpa [#allocation4], 1 }
 0x368   :  { %646 = vsyncpa [#allocation4 + $0x1], 1 }
 0x369   :  { %647 = vsyncpa [#allocation5], 1 }
 0x36a   :  { %649 = vsyncpa [#allocation5 + $0x1], 1 }

</bundles_post_ra>
